<compile_context>
chip_gen: v7x
topology: tpu7x:2x2x1
jax: 0.10.0
libtpu: 0.0.40
codegen_flags: <defaults>
</compile_context>

<pallas_src>
import functools

import jax
import jax.numpy as jnp
from jax import lax
from jax.experimental import pallas as pl
from jax.experimental.pallas import tpu as pltpu

DROP_P = 0.1
KEEP_SCALE = 1.0 / (1.0 - DROP_P)
# drop iff hashed uniform uint32 < DROP_P * 2^32
DROP_THRESHOLD = int(DROP_P * (1 << 32))
_GOLDEN = 0x9E3779B9  # seed salt multiplier


def _attn_dropout_kernel(x1_ref, x2_ref, o_ref, *, salt, batch_block,
                         s1, s2, training):
    # x1_ref: (bb, S1, D) f32, x2_ref: (bb, S2, D) f32, o_ref: (bb, S1, D)
    q = x1_ref[...]
    k = x2_ref[...]

    # v1/v2 = x1 @ x2^T (batched NT matmul, no materialized transpose of k)
    s = jnp.einsum("bqd,bkd->bqk", q, k,
                   preferred_element_type=jnp.float32)      # (bb, S1, S2)

    # v3 = softmax(s, axis=-1)
    m = jnp.max(s, axis=-1, keepdims=True)
    e = jnp.exp(s - m)                                       # s dies here
    denom = jnp.sum(e, axis=-1, keepdims=True)
    inv = 1.0 / denom                                        # (bb, S1, 1)

    if training:
        # v4 = inverted dropout(p=0.1).  Counter-based hash PRNG (murmur3
        # fmix32) — portable to TPU and interpret mode, deterministic per
        # (seed, global element index) even with a parallel batch grid axis.
        b_off = pl.program_id(0) * batch_block
        bi = lax.broadcasted_iota(jnp.int32, e.shape, 0)
        qi = lax.broadcasted_iota(jnp.int32, e.shape, 1)
        ki = lax.broadcasted_iota(jnp.int32, e.shape, 2)
        ctr = ((b_off + bi) * s1 + qi) * s2 + ki
        x = ctr.astype(jnp.uint32) + jnp.uint32(salt)
        x = x ^ (x >> 16)
        x = x * jnp.uint32(0x85EBCA6B)
        x = x ^ (x >> 13)
        x = x * jnp.uint32(0xC2B2AE35)
        x = x ^ (x >> 16)
        keep = x >= jnp.uint32(DROP_THRESHOLD)
        # fuse softmax normalization with the dropout keep-scale: one multiply
        probs = jnp.where(keep, e * (inv * KEEP_SCALE), 0.0)
    else:
        probs = e * inv

    # v5 = v4 @ x2
    out = jnp.einsum("bqk,bkd->bqd", probs, k,
                     preferred_element_type=jnp.float32)
    o_ref[...] = out.astype(o_ref.dtype)


def _batch_blocking(batch, s1, s2, d):
    """Choose (batch_block, grid_steps).

    Single-TensorCore chips (v5e/v6e) and the interpreter: collapse the batch
    into as few grid steps as the VMEM budget allows (each grid step costs
    ~0.35us of fixed pipeline overhead).  Two-TensorCore chips (v7x /
    megacore): keep at least 2 parallel grid steps so both cores get work.
    """
    # rough per-batch VMEM bytes: double-buffered in/out blocks + fp32 score temps
    per_batch = 4 * (2 * (s1 * d + s2 * d + s1 * d) + 4 * s1 * s2)
    budget = 20 << 20                     # stay under default scoped-VMEM limits
    bb_cap = max(1, budget // per_batch)

    dev = jax.devices()[0]
    kind = (getattr(dev, "device_kind", "") or "").lower()
    two_core = (dev.platform == "tpu"
                and not any(t in kind for t in ("lite", "v5e", "v6e")))
    min_steps = 2 if (two_core and batch >= 2) else 1

    bb = max(1, min(batch // min_steps, bb_cap))
    while batch % bb:                     # block must tile the batch exactly
        bb -= 1
    return bb, batch // bb


def attention_dropout(x1, x2, seed=0, training=True):
    B, S1, D = x1.shape
    B2, S2, D2 = x2.shape
    assert B == B2 and D == D2

    bb, steps = _batch_blocking(B, S1, S2, D)
    salt = (int(seed) * _GOLDEN) & 0xFFFFFFFF

    kernel = functools.partial(
        _attn_dropout_kernel, salt=salt, batch_block=bb,
        s1=S1, s2=S2, training=training)

    return pl.pallas_call(
        kernel,
        out_shape=jax.ShapeDtypeStruct((B, S1, D), x1.dtype),
        grid=(steps,),
        in_specs=[
            pl.BlockSpec((bb, S1, D), lambda i: (i, 0, 0)),
            pl.BlockSpec((bb, S2, D), lambda i: (i, 0, 0)),
        ],
        out_specs=pl.BlockSpec((bb, S1, D), lambda i: (i, 0, 0)),
        compiler_params=pltpu.CompilerParams(
            dimension_semantics=("parallel",)),   # independent batch blocks
    )(x1, x2)


if __name__ == "__main__":
    # Small shapes consistent with the module: batch=2, seq1=64, seq2=56, dim=128
    key = jax.random.PRNGKey(0)
    k1, k2 = jax.random.split(key)
    x1 = jax.random.normal(k1, (2, 64, 128), dtype=jnp.float32)
    x2 = jax.random.normal(k2, (2, 56, 128), dtype=jnp.float32)

    out = attention_dropout(x1, x2, seed=0)
    jax.block_until_ready(out)

    assert out.shape == (2, 64, 128)
    assert jnp.isfinite(out).all()
    print("KERNEL_OK")
</pallas_src>

<mosaic_0001>
module attributes {stable_mosaic.version = 11 : i64} {
  func.func @_attn_dropout_kernel(%arg0: i32, %arg1: memref<2x64x128xf32, #tpu.memory_space<vmem>>, %arg2: memref<2x56x128xf32, #tpu.memory_space<vmem>>, %arg3: memref<2x64x128xf32, #tpu.memory_space<vmem>>) attributes {dimension_semantics = [#tpu.dimension_semantics<parallel>], iteration_bounds = array<i64: 1>, scalar_prefetch = 0 : i64, scratch_operands = 0 : i64, tpu.core_type = #tpu.core_type<tc>, window_params = [{transform_indices = @transform_0, window_bounds = array<i64: 2, 64, 128>}, {transform_indices = @transform_1, window_bounds = array<i64: 2, 56, 128>}, {transform_indices = @transform_2, window_bounds = array<i64: 2, 64, 128>}]} {
    %c0 = arith.constant 0 : index
    %c0_0 = arith.constant 0 : index
    %c0_1 = arith.constant 0 : index
    %0 = vector.load %arg1[%c0, %c0_0, %c0_1] : memref<2x64x128xf32, #tpu.memory_space<vmem>>, vector<2x64x128xf32>
    %c0_2 = arith.constant 0 : index
    %c0_3 = arith.constant 0 : index
    %c0_4 = arith.constant 0 : index
    %1 = vector.load %arg2[%c0_2, %c0_3, %c0_4] : memref<2x56x128xf32, #tpu.memory_space<vmem>>, vector<2x56x128xf32>
    "tpu.trace_start"() <{level = 10 : i32, message = "bqd,bkd->bqk"}> : () -> ()
    %cst = arith.constant dense<0.000000e+00> : vector<2x64x56xf32>
    %2 = tpu.matmul %0, %1, %cst {dimension_numbers = #tpu.dot_dimension_numbers<[2], [2], [1], [1], [0, 0, 0, 1, 1, 1], [0], [0]>} : vector<2x64x128xf32>, vector<2x56x128xf32>, vector<2x64x56xf32> -> vector<2x64x56xf32>
    "tpu.trace_stop"() : () -> ()
    %cst_5 = arith.constant dense<0xFF800000> : vector<2x64xf32>
    %3 = vector.multi_reduction <maximumf>, %2, %cst_5 [2] : vector<2x64x56xf32> to vector<2x64xf32>
    %4 = vector.shape_cast %3 : vector<2x64xf32> to vector<2x64x1xf32>
    %5 = vector.broadcast %4 : vector<2x64x1xf32> to vector<2x64x56xf32>
    %6 = arith.subf %2, %5 : vector<2x64x56xf32>
    %7 = math.exp %6 : vector<2x64x56xf32>
    %cst_6 = arith.constant dense<0.000000e+00> : vector<2x64xf32>
    %8 = vector.multi_reduction <add>, %7, %cst_6 [2] : vector<2x64x56xf32> to vector<2x64xf32>
    %9 = vector.shape_cast %8 : vector<2x64xf32> to vector<2x64x1xf32>
    %cst_7 = arith.constant 1.000000e+00 : f32
    %10 = vector.broadcast %cst_7 : f32 to vector<2x64x1xf32>
    %11 = arith.divf %10, %9 : vector<2x64x1xf32>
    %c2_i32 = arith.constant 2 : i32
    %12 = arith.muli %arg0, %c2_i32 : i32
    %13 = tpu.iota {dimensions = array<i32: 0>} : vector<2x64x56xi32>
    %14 = tpu.iota {dimensions = array<i32: 1>} : vector<2x64x56xi32>
    %15 = tpu.iota {dimensions = array<i32: 2>} : vector<2x64x56xi32>
    %16 = vector.broadcast %12 : i32 to vector<2x64x56xi32>
    %17 = arith.addi %16, %13 : vector<2x64x56xi32>
    %c64_i32 = arith.constant 64 : i32
    %18 = vector.broadcast %c64_i32 : i32 to vector<2x64x56xi32>
    %19 = arith.muli %17, %18 : vector<2x64x56xi32>
    %20 = arith.addi %19, %14 : vector<2x64x56xi32>
    %c56_i32 = arith.constant 56 : i32
    %21 = vector.broadcast %c56_i32 : i32 to vector<2x64x56xi32>
    %22 = arith.muli %20, %21 : vector<2x64x56xi32>
    %23 = arith.addi %22, %15 : vector<2x64x56xi32>
    %c0_i32 = arith.constant 0 : i32
    %24 = vector.broadcast %c0_i32 : i32 to vector<2x64x56xi32>
    %25 = arith.addi %23, %24 : vector<2x64x56xi32>
    %c16_i32 = arith.constant 16 : i32
    %26 = vector.broadcast %c16_i32 : i32 to vector<2x64x56xi32>
    %27 = arith.shrui %25, %26 : vector<2x64x56xi32>
    %28 = arith.xori %25, %27 : vector<2x64x56xi32>
    %c-2048144789_i32 = arith.constant -2048144789 : i32
    %29 = vector.broadcast %c-2048144789_i32 : i32 to vector<2x64x56xi32>
    %30 = arith.muli %28, %29 : vector<2x64x56xi32>
    %c13_i32 = arith.constant 13 : i32
    %31 = vector.broadcast %c13_i32 : i32 to vector<2x64x56xi32>
    %32 = arith.shrui %30, %31 : vector<2x64x56xi32>
    %33 = arith.xori %30, %32 : vector<2x64x56xi32>
    %c-1028477387_i32 = arith.constant -1028477387 : i32
    %34 = vector.broadcast %c-1028477387_i32 : i32 to vector<2x64x56xi32>
    %35 = arith.muli %33, %34 : vector<2x64x56xi32>
    %c16_i32_8 = arith.constant 16 : i32
    %36 = vector.broadcast %c16_i32_8 : i32 to vector<2x64x56xi32>
    %37 = arith.shrui %35, %36 : vector<2x64x56xi32>
    %38 = arith.xori %35, %37 : vector<2x64x56xi32>
    %c429496729_i32 = arith.constant 429496729 : i32
    %39 = vector.broadcast %c429496729_i32 : i32 to vector<2x64x56xi32>
    %40 = arith.cmpi uge, %38, %39 : vector<2x64x56xi32>
    %cst_9 = arith.constant 1.11111116 : f32
    %41 = vector.broadcast %cst_9 : f32 to vector<2x64x1xf32>
    %42 = arith.mulf %11, %41 : vector<2x64x1xf32>
    %43 = vector.broadcast %42 : vector<2x64x1xf32> to vector<2x64x56xf32>
    %44 = arith.mulf %7, %43 : vector<2x64x56xf32>
    %cst_10 = arith.constant 0.000000e+00 : f32
    %45 = vector.broadcast %cst_10 : f32 to vector<2x64x56xf32>
    %46 = arith.select %40, %44, %45 : vector<2x64x56xi1>, vector<2x64x56xf32>
    "tpu.trace_start"() <{level = 10 : i32, message = "bqk,bkd->bqd"}> : () -> ()
    %cst_11 = arith.constant dense<0.000000e+00> : vector<2x64x128xf32>
    %47 = tpu.matmul %46, %1, %cst_11 {dimension_numbers = #tpu.dot_dimension_numbers<[2], [1], [1], [2], [0, 0, 0, 1, 1, 2], [0], [0]>} : vector<2x64x56xf32>, vector<2x56x128xf32>, vector<2x64x128xf32> -> vector<2x64x128xf32>
    "tpu.trace_stop"() : () -> ()
    %c0_12 = arith.constant 0 : index
    %c0_13 = arith.constant 0 : index
    %c0_14 = arith.constant 0 : index
    %48 = vector.load %arg3[%c0_12, %c0_13, %c0_14] : memref<2x64x128xf32, #tpu.memory_space<vmem>>, vector<2x64x128xf32>
    tpu.vector_store %arg3[%c0_12, %c0_13, %c0_14], %47 {strides = array<i32>} : memref<2x64x128xf32, #tpu.memory_space<vmem>>, vector<2x64x128xf32>,
    return
  }
  func.func @transform_0(%arg0: i32) -> (i32, i32, i32) {
    %c0_i32 = arith.constant 0 : i32
    %c0_i32_0 = arith.constant 0 : i32
    %c0_i32_1 = arith.constant 0 : i32
    return %arg0, %c0_i32, %c0_i32_0 : i32, i32, i32
  }
  func.func @transform_1(%arg0: i32) -> (i32, i32, i32) {
    %c0_i32 = arith.constant 0 : i32
    %c0_i32_0 = arith.constant 0 : i32
    %c0_i32_1 = arith.constant 0 : i32
    return %arg0, %c0_i32, %c0_i32_0 : i32, i32, i32
  }
  func.func @transform_2(%arg0: i32) -> (i32, i32, i32) {
    %c0_i32 = arith.constant 0 : i32
    %c0_i32_0 = arith.constant 0 : i32
    %c0_i32_1 = arith.constant 0 : i32
    return %arg0, %c0_i32, %c0_i32_0 : i32, i32, i32
  }
}

</mosaic_0001>

<bundles_post_ra>
// kernel: tpu_custom_call.1
= control target key start
LH: loop header
LB: loop body
LE: loop exit
PB: predicated region body
PF: predicated region fallthrough
CT: control target
= control target key end

     0   :  { %7 = vsyncpa [#allocation3], 0  ;;  %s1702_s0 = inlined_call_operand.hbm [shape: f32[2,64,128], index: 0, kind: input, shape index: {}]   ;;  %s1703_s1 = inlined_call_operand.hbm [shape: f32[2,56,128], index: 1, kind: input, shape index: {}]   ;;  %s1704_s2 = inlined_call_operand.hbm [shape: f32[2,64,128], index: 2, kind: output, shape index: {}]  }
   0x1   :  { %8 = vsyncpa [#allocation6], 0 }
   0x2   :  { %9 = vsyncpa [#allocation4], 0  ;;  %s1374_s9 = smov [#allocation2]   ;;  %s1302_s13 = scalar_lea.hbm %s1702_s0, 2048 }
   0x3   :  { %s15_s10 = sshll.u32 %s1374_s9, 4  ;;  %p1303_p0 = scmp.ne.s32.totalorder %s1702_s0, %s1302_s13  ;;  %s16_s10 = int_to_ptr.vmem [resolvable:$true] %s15_s10 }
   0x4   :  { %p1306_p1 = scmp.lt.u32.totalorder %s1302_s13, %s1702_s0 }
   0x6   :  { %p1308_p2 = pnand %p1306_p1, %p1303_p0 }
   0x8   :  { %1311 = shalt.err (!%p1308_p2)
}
   0x9   :  { %s1312_s18 = scalar_lea.vmem %s16_s10, 2048  ;;  %p1317_p4 = scmp.lt.s32.totalorder %s16_s10, %s16_s10 }
   0xa   :  { %p1313_p3 = scmp.ne.s32.totalorder %s16_s10, %s1312_s18  ;;  %p1318_p5 = scmp.lt.s32.totalorder %s1312_s18, %s1312_s18 }
   0xc   :  { %p1319_p6 = por %p1318_p5, %p1317_p4 }
   0xe   :  { %p1320_p7 = pnand %p1319_p6, %p1313_p3 }
  0x10   :  { %1323 = shalt.err (!%p1320_p7)
}
  0x11   :  { %s1375_s19 = smov 128   ;;  %s1376_s20 = smov 8  }
  0x12   :  { %21 = dma.hbm_to_vmem [thread:$0]  %s1702_s0, 2048, %s16_s10, [#allocation3], %s1375_s19, %s1375_s19, %s1376_s20  }
  0x13   :  { %s1377_s23 = smov [#allocation5]   ;;  %s1324_s27 = scalar_lea.hbm %s1703_s1, 1792 }
  0x14   :  { %s27_s24 = sshll.u32 %s1377_s23, 4  ;;  %p1325_p8 = scmp.ne.s32.totalorder %s1703_s1, %s1324_s27  ;;  %s28_s24 = int_to_ptr.vmem [resolvable:$true] %s27_s24 }
  0x15   :  { %p1328_p9 = scmp.lt.u32.totalorder %s1324_s27, %s1703_s1 }
  0x17   :  { %p1330_p10 = pnand %p1328_p9, %p1325_p8 }
  0x19   :  { %1333 = shalt.err (!%p1330_p10)
}
  0x1a   :  { %s1334_s4 = scalar_lea.vmem %s28_s24, 1792  ;;  %p1339_p12 = scmp.lt.s32.totalorder %s28_s24, %s28_s24 }
  0x1b   :  { %p1335_p11 = scmp.ne.s32.totalorder %s28_s24, %s1334_s4  ;;  %p1340_p13 = scmp.lt.s32.totalorder %s1334_s4, %s1334_s4 }
  0x1d   :  { %p1341_p0 = por %p1340_p13, %p1339_p12 }
  0x1f   :  { %p1342_p1 = pnand %p1341_p0, %p1335_p11 }
  0x21   :  { %1345 = shalt.err (!%p1342_p1)
}
  0x22   :  { %33 = dma.hbm_to_vmem [thread:$0]  %s1703_s1, 1792, %s28_s24, [#allocation6], %s1375_s19, %s1375_s19, %s1376_s20  }
  0x23   :  { %1368 = dma.done.wait [#allocation3], 2048  }
  0x24   :  { %1369 = vsyncadd [#allocation3], 4294965248 }
  0x25   :  { %1370 = dma.done.wait [#allocation6], 1792  }
  0x26   :  { %1371 = vsyncadd [#allocation6], 4294965504  ;;  %v56_v0 = vld [vmem:[#allocation5] sm:$0xff]  ;;  %v57_v1 = vld [vmem:[#allocation5 + $0x8] sm:$0xff]  ;;  %vm280_vm0 = vcmask 457728   ;;  %s1378_s1 = smov [#allocation7]  }
  0x27   :  { %v63_v2 = vld [vmem:[#allocation5 + $0x38] sm:$0xff]  ;;  %v1185_v3 = vpack.c.bf16 %v57_v1, %v56_v0  ;;  %v64_v4 = vld [vmem:[#allocation5 + $0x40] sm:$0xff]  ;;  %v58_v5 = vld [vmem:[#allocation5 + $0x10] sm:$0xff]  ;;  %s992_s6 = sshll.u32 %s1378_s1, 4  ;;  %s993_s6 = int_to_ptr.vmem [resolvable:$true] %s992_s6 }
  0x28   :  { %v59_v6 = vld [vmem:[#allocation5 + $0x18] sm:$0xff]  ;;  %v1197_v7 = vpack.c.bf16 %v64_v4, %v63_v2  ;;  %v65_v9 = vld [vmem:[#allocation5 + $0x48] sm:$0xff]  ;;  %v66_v10 = vld [vmem:[#allocation5 + $0x50] sm:$0xff]  ;;  %s1346_s7 = scalar_lea.vmem %s993_s6, 2048  ;;  %p1351_p3 = scmp.lt.s32.totalorder %s993_s6, %s993_s6 }
  0x29   :  { %v1189_v8 = vpack.c.bf16 %v59_v6, %v58_v5  ;;  %1186 = vmatprep.subr.bf16.mxu0 %v1185_v3  ;;  %v1201_v11 = vpack.c.bf16 %v66_v10, %v65_v9  ;;  %v40_v12 = vld [vmem:[#allocation2] sm:$0xff]  ;;  %v61_v15 = vld [vmem:[#allocation5 + $0x28] sm:$0xff]  ;;  %v67_v16 = vld [vmem:[#allocation5 + $0x58] sm:$0xff]  ;;  %p1347_p2 = scmp.ne.s32.totalorder %s993_s6, %s1346_s7  ;;  %p1352_p4 = scmp.lt.s32.totalorder %s1346_s7, %s1346_s7 }
  0x2a   :  { %1188 = vmatpush3.bf16.xpose.msra.mxu0 %v1185_v3  ;;  %1198 = vmatprep.subr.bf16.mxu1 %v1197_v7  ;;  %v48_v13 = vld [vmem:[#allocation2 + $0x40] sm:$0xff]  ;;  %v62_v20 = vld [vmem:[#allocation5 + $0x30] sm:$0xff]  ;;  %v69_v21 = vld [vmem:[#allocation5 + $0x68] sm:$0xff] }
  0x2b   :  { %1200 = vmatpush3.bf16.xpose.msra.mxu1 %v1197_v7  ;;  %1190 = vmatprep.subr.bf16.mxu0 %v1189_v8  ;;  %v60_v14 = vld [vmem:[#allocation5 + $0x20] sm:$0xff]  ;;  %v41_v22 = vld [vmem:[#allocation2 + $0x8] sm:$0xff]  ;;  %v42_v24 = vld [vmem:[#allocation2 + $0x10] sm:$0xff]  ;;  %p1353_p5 = por %p1352_p4, %p1351_p3 }
  0x2c   :  { %1202 = vmatprep.subr.bf16.mxu1 %v1201_v11  ;;  %1095 = vmatprep.mubr.f32.mxu0 %v40_v12  ;;  %v68_v17 = vld [vmem:[#allocation5 + $0x60] sm:$0xff]  ;;  %v1193_v18 = vpack.c.bf16 %v61_v15, %v60_v14  ;;  %v49_v23 = vld [vmem:[#allocation2 + $0x48] sm:$0xff]  ;;  %v50_v25 = vld [vmem:[#allocation2 + $0x50] sm:$0xff] }
  0x2d   :  { %1121 = vmatprep.mubr.f32.mxu1 %v48_v13  ;;  %v1205_v19 = vpack.c.bf16 %v68_v17, %v67_v16  ;;  %v43_v26 = vld [vmem:[#allocation2 + $0x18] sm:$0xff]  ;;  %v44_v28 = vld [vmem:[#allocation2 + $0x20] sm:$0xff]  ;;  %v45_v30 = vld [vmem:[#allocation2 + $0x28] sm:$0xff]  ;;  %p1354_p6 = pnand %p1353_p5, %p1347_p2 }
  0x2e   :  { %v51_v27 = vld [vmem:[#allocation2 + $0x58] sm:$0xff]  ;;  %v52_v29 = vld [vmem:[#allocation2 + $0x60] sm:$0xff]  ;;  %v53_v31 = vld [vmem:[#allocation2 + $0x68] sm:$0xff] }
  0x2f   :  { %v46_v32 = vld [vmem:[#allocation2 + $0x30] sm:$0xff]  ;;  %v47_v34 = vld [vmem:[#allocation2 + $0x38] sm:$0xff] }
  0x30   :  { %v54_v33 = vld [vmem:[#allocation2 + $0x70] sm:$0xff]  ;;  %v55_v35 = vld [vmem:[#allocation2 + $0x78] sm:$0xff] }
  0x32   :  { %1192 = vmatpush3.bf16.xpose.msra.mxu0 %v1189_v8 }
  0x33   :  { %1204 = vmatpush3.bf16.xpose.msra.mxu1 %v1201_v11  ;;  %1194 = vmatprep.subr.bf16.mxu0 %v1193_v18 }
  0x34   :  { %1206 = vmatprep.subr.bf16.mxu1 %v1205_v19 }
  0x3a   :  { %1196 = vmatpush3.bf16.xpose.msra.mxu0 %v1193_v18 }
  0x3b   :  { %1208 = vmatpush3.bf16.xpose.msra.mxu1 %v1205_v19  ;;  %1093 = vmatprep.subr.mxu0 %v62_v20 }
  0x3c   :  { %1119 = vmatprep.subr.mxu1 %v69_v21 }
  0x42   :  { %1094 = vmatpush3.xpose.msra.mxu0 %v62_v20 }
  0x43   :  { %1120 = vmatpush3.xpose.msra.mxu1 %v69_v21  ;;  %1210 = vmatprep.subr.bf16.mxu0 %v1185_v3 }
  0x44   :  { %1222 = vmatprep.subr.bf16.mxu1 %v1197_v7 }
  0x45   :  { %1096 = vmatmul.mubr.f32.vlgmr.msra.gmra.mrb[0].mxu0 %v41_v22 }
  0x46   :  { %1122 = vmatmul.mubr.f32.vlgmr.msra.gmra.mrb[0].mxu1 %v49_v23  ;;  %1098 = vmatprep.mubr.f32.mxu0 %v42_v24 }
  0x47   :  { %1124 = vmatprep.mubr.f32.mxu1 %v50_v25  ;;  %1212 = vmatpush3.bf16.msra.mxu0 %v1185_v3 }
  0x48   :  { %1214 = vmatprep.subr.bf16.mxu0 %v1189_v8  ;;  %1224 = vmatpush3.bf16.msra.mxu1 %v1197_v7 }
  0x49   :  { %1099 = vmatmul.mubr.f32.gmra.mrb[2].mxu0 %v43_v26  ;;  %1226 = vmatprep.subr.bf16.mxu1 %v1201_v11 }
  0x4a   :  { %1125 = vmatmul.mubr.f32.gmra.mrb[2].mxu1 %v51_v27  ;;  %1101 = vmatprep.mubr.f32.mxu0 %v44_v28 }
  0x4b   :  { %1127 = vmatprep.mubr.f32.mxu1 %v52_v29  ;;  %1216 = vmatpush3.bf16.msra.mxu0 %v1189_v8 }
  0x4c   :  { %1218 = vmatprep.subr.bf16.mxu0 %v1193_v18  ;;  %1228 = vmatpush3.bf16.msra.mxu1 %v1201_v11 }
  0x4d   :  { %1102 = vmatmul.mubr.f32.gmra.mrb[4].mxu0 %v45_v30  ;;  %1230 = vmatprep.subr.bf16.mxu1 %v1205_v19 }
  0x4e   :  { %1128 = vmatmul.mubr.f32.gmra.mrb[4].mxu1 %v53_v31  ;;  %1104 = vmatprep.mubr.f32.mxu0 %v46_v32 }
  0x4f   :  { %1130 = vmatprep.mubr.f32.mxu1 %v54_v33  ;;  %1220 = vmatpush3.bf16.msra.mxu0 %v1193_v18 }
  0x50   :  { %1145 = vmatprep.subr.mxu0 %v62_v20  ;;  %1232 = vmatpush3.bf16.msra.mxu1 %v1205_v19 }
  0x51   :  { %1105 = vmatmul.mubr.f32.gmra.mrb[6].mxu0 %v47_v34  ;;  %1171 = vmatprep.subr.mxu1 %v69_v21 }
  0x52   :  { %1131 = vmatmul.mubr.f32.gmra.mrb[6].mxu1 %v55_v35 }
  0x53   :  { %1146 = vmatpush3.msra.mxu0 %v62_v20 }
  0x54   :  { %1172 = vmatpush3.msra.mxu1 %v69_v21 }
 0x118   :  { %v1097_v36 = vpop.f32.mrb[0].mxu0 }
 0x119   :  { %v136_v37 = vpop.f32.mrb[1].mxu0  ;;  %v284_v38 = vsel %vm280_vm0, %v1097_v36, -inf  ;;  %v1123_v39 = vpop.f32.mrb[0].mxu1 }
 0x11a   :  { %285 = vmax.xlane.f32.xlu1 %v284_v38  ;;  %v281_v40 = vsel %vm280_vm0, %v136_v37, -inf  ;;  %v241_v41 = vpop.f32.mrb[1].mxu1  ;;  %v308_v42 = vsel %vm280_vm0, %v1123_v39, -inf }
 0x11b   :  { %282 = vmax.xlane.f32.xlu0 %v281_v40  ;;  %v305_v43 = vsel %vm280_vm0, %v241_v41, -inf }
 0x11c   :  { %v1100_v44 = vpop.f32.mrb[2].mxu0 }
 0x11d   :  { %v1126_v45 = vpop.f32.mrb[2].mxu1  ;;  %v1428_v46 = vpop.f32.mrb[3].mxu0  ;;  %v290_v49 = vsel %vm280_vm0, %v1100_v44, -inf }
 0x11e   :  { %309 = vmax.xlane.f32.xlu1 %v308_v42  ;;  %v1430_v47 = vpop.f32.mrb[3].mxu1  ;;  %v314_v48 = vsel %vm280_vm0, %v1126_v45, -inf  ;;  %v287_v55 = vsel %vm280_vm0, %v1428_v46, -inf }
 0x11f   :  { %306 = vmax.xlane.f32.xlu0 %v305_v43  ;;  %v311_v54 = vsel %vm280_vm0, %v1430_v47, -inf }
 0x120   :  { %v1434_v50 = vpop.f32.mrb[4].mxu0 }
 0x121   :  { %v1436_v51 = vpop.f32.mrb[4].mxu1  ;;  %v1438_v52 = vpop.f32.mrb[5].mxu0  ;;  %v296_v61 = vsel %vm280_vm0, %v1434_v50, -inf }
 0x122   :  { %315 = vmax.xlane.f32.xlu1 %v314_v48  ;;  %v1440_v53 = vpop.f32.mrb[5].mxu1  ;;  %v320_v60 = vsel %vm280_vm0, %v1436_v51, -inf  ;;  %v293_v63 = vsel %vm280_vm0, %v1438_v52, -inf }
 0x123   :  { %291 = vmax.xlane.f32.xlu0 %v290_v49  ;;  %v317_v62 = vsel %vm280_vm0, %v1440_v53, -inf }
 0x124   :  { %v1446_v56 = vpop.f32.mrb[6].mxu0 }
 0x125   :  { %v1448_v57 = vpop.f32.mrb[6].mxu1  ;;  %v1450_v58 = vpop.f32.mrb[7].mxu0  ;;  %v302_v3 = vsel %vm280_vm0, %v1446_v56, -inf }
 0x126   :  { %312 = vmax.xlane.f32.xlu1 %v311_v54  ;;  %v1452_v59 = vpop.f32.mrb[7].mxu1  ;;  %v299_v1 = vsel %vm280_vm0, %v1450_v58, -inf  ;;  %v326_v2 = vsel %vm280_vm0, %v1448_v57, -inf }
 0x127   :  { %288 = vmax.xlane.f32.xlu0 %v287_v55  ;;  %v323_v0 = vsel %vm280_vm0, %v1452_v59, -inf }
 0x12a   :  { %321 = vmax.xlane.f32.xlu1 %v320_v60 }
 0x12b   :  { %297 = vmax.xlane.f32.xlu0 %v296_v61 }
 0x12e   :  { %318 = vmax.xlane.f32.xlu1 %v317_v62 }
 0x12f   :  { %294 = vmax.xlane.f32.xlu0 %v293_v63 }
 0x132   :  { %324 = vmax.xlane.f32.xlu1 %v323_v0 }
 0x133   :  { %300 = vmax.xlane.f32.xlu0 %v299_v1 }
 0x136   :  { %327 = vmax.xlane.f32.xlu1 %v326_v2 }
 0x137   :  { %303 = vmax.xlane.f32.xlu0 %v302_v3 }
 0x1a7   :  { %v286_v4 = vpop.xlane.xlu1 %285 }
 0x1a8   :  { %v330_v5 = vsub.f32 %v1097_v36, %v286_v4  ;;  %v283_v6 = vpop.xlane.xlu0 %282 }
 0x1a9   :  { %v329_v7 = vsub.f32 %v136_v37, %v283_v6 }
 0x1aa   :  { %v347_v8 = vmul.f32 1.442695, %v330_v5 }
 0x1ab   :  { %v345_v9 = vmul.f32 1.442695, %v329_v7  ;;  %v310_v10 = vpop.xlane.xlu1 %309 }
 0x1ac   :  { %1238 = vpow2.f32 %v347_v8  ;;  %v338_v11 = vsub.f32 %v1123_v39, %v310_v10  ;;  %v307_v12 = vpop.xlane.xlu0 %306 }
 0x1ad   :  { %v337_v13 = vsub.f32 %v241_v41, %v307_v12  ;;  %1240 = vpow2.f32 %v345_v9 }
 0x1ae   :  { %v363_v14 = vmul.f32 1.442695, %v338_v11 }
 0x1af   :  { %v361_v15 = vmul.f32 1.442695, %v337_v13  ;;  %v316_v16 = vpop.xlane.xlu1 %315 }
 0x1b0   :  { %1242 = vpow2.f32 %v363_v14  ;;  %v340_v17 = vsub.f32 %v1126_v45, %v316_v16  ;;  %v292_v18 = vpop.xlane.xlu0 %291 }
 0x1b1   :  { %v332_v19 = vsub.f32 %v1100_v44, %v292_v18  ;;  %1244 = vpow2.f32 %v361_v15 }
 0x1b2   :  { %v367_v20 = vmul.f32 1.442695, %v340_v17 }
 0x1b3   :  { %v351_v21 = vmul.f32 1.442695, %v332_v19  ;;  %v313_v22 = vpop.xlane.xlu1 %312 }
 0x1b4   :  { %v339_v23 = vsub.f32 %v1430_v47, %v313_v22  ;;  %v289_v24 = vpop.xlane.xlu0 %288 }
 0x1b5   :  { %1246 = vpow2.f32 %v351_v21  ;;  %v331_v25 = vsub.f32 %v1428_v46, %v289_v24 }
 0x1b6   :  { %v1472_v26 = vpop.eup %1238  ;;  %1248 = vpow2.f32 %v367_v20  ;;  %v365_v27 = vmul.f32 1.442695, %v339_v23  ;;  %v458_v20 = vlaneseq }
 0x1b7   :  { %v349_v28 = vmul.f32 1.442695, %v331_v25  ;;  %v322_v29 = vpop.xlane.xlu1 %321  ;;  %v380_v30 = vsel %vm280_vm0, %v1472_v26, 0.0  ;;  %v1476_v31 = vpop.eup %1240 }
 0x1b8   :  { %v342_v32 = vsub.f32 %v1436_v51, %v322_v29  ;;  %v298_v33 = vpop.xlane.xlu0 %297  ;;  %381 = vadd.xlane.f32.xlu0 %v380_v30  ;;  %v377_v40 = vsel %vm280_vm0, %v1476_v31, 0.0  ;;  %v1544_v21 = vshrl.u32 %v458_v20, 7  ;;  %v1547_v23 = vand.u32 127, %v458_v20 }
 0x1b9   :  { %1250 = vpow2.f32 %v349_v28  ;;  %v334_v34 = vsub.f32 %v1434_v50, %v298_v33 }
 0x1ba   :  { %v1480_v35 = vpop.eup %1242  ;;  %1252 = vpow2.f32 %v365_v27  ;;  %v371_v36 = vmul.f32 1.442695, %v342_v32  ;;  %v460_v22 = vadd.s32 8, %v1544_v21  ;;  %v489_v32 = vmul.u32 56, %v1544_v21 }
 0x1bb   :  { %v355_v37 = vmul.f32 1.442695, %v334_v34  ;;  %v319_v38 = vpop.xlane.xlu1 %318  ;;  %v404_v39 = vsel %vm280_vm0, %v1480_v35, 0.0  ;;  %v1486_v41 = vpop.eup %1244  ;;  %v481_v33 = vadd.s32 64, %v1544_v21  ;;  %v461_v34 = vadd.s32 16, %v1544_v21 }
 0x1bc   :  { %v341_v42 = vsub.f32 %v1440_v53, %v319_v38  ;;  %405 = vadd.xlane.f32.xlu1 %v404_v39  ;;  %v295_v43 = vpop.xlane.xlu0 %294  ;;  %378 = vadd.xlane.f32.xlu0 %v377_v40  ;;  %v401_v49 = vsel %vm280_vm0, %v1486_v41, 0.0  ;;  %v490_v24 = vmul.u32 56, %v460_v22  ;;  %v482_v25 = vadd.s32 64, %v460_v22 }
 0x1bd   :  { %1254 = vpow2.f32 %v355_v37  ;;  %v333_v44 = vsub.f32 %v1438_v52, %v295_v43  ;;  %v505_v39 = vadd.s32 %v489_v32, %v1547_v23  ;;  %v497_v40 = vmul.u32 56, %v481_v33 }
 0x1be   :  { %1256 = vpow2.f32 %v371_v36  ;;  %v369_v45 = vmul.f32 1.442695, %v341_v42  ;;  %v506_v27 = vadd.s32 %v490_v24, %v1547_v23  ;;  %v498_v28 = vmul.u32 56, %v482_v25 }
 0x1bf   :  { %v1490_v46 = vpop.eup %1246  ;;  %v353_v47 = vmul.f32 1.442695, %v333_v44  ;;  %v325_v48 = vpop.xlane.xlu1 %324  ;;  %v462_v36 = vadd.s32 24, %v1544_v21  ;;  %v483_v43 = vadd.s32 64, %v461_v34 }
 0x1c0   :  { %v1494_v50 = vpop.eup %1248  ;;  %v343_v51 = vsub.f32 %v1452_v59, %v325_v48  ;;  %402 = vadd.xlane.f32.xlu1 %v401_v49  ;;  %v301_v53 = vpop.xlane.xlu0 %300  ;;  %v386_v54 = vsel %vm280_vm0, %v1490_v46, 0.0  ;;  %v522_v29 = vshrl.u32 %v506_v27, 16  ;;  %v514_v30 = vadd.s32 %v498_v28, %v1547_v23 }
 0x1c1   :  { %1258 = vpow2.f32 %v353_v47  ;;  %v335_v52 = vsub.f32 %v1450_v58, %v301_v53  ;;  %387 = vadd.xlane.f32.xlu0 %v386_v54  ;;  %v410_v63 = vsel %vm280_vm0, %v1494_v50, 0.0  ;;  %v492_v42 = vmul.u32 56, %v462_v36 }
 0x1c2   :  { %1260 = vpow2.f32 %v369_v45  ;;  %v373_v55 = vmul.f32 1.442695, %v343_v51  ;;  %v538_v37 = vxor.u32 %v522_v29, %v506_v27  ;;  %v530_v38 = vshrl.u32 %v514_v30, 16 }
 0x1c3   :  { %v1500_v60 = vpop.eup %1250  ;;  %v357_v61 = vmul.f32 1.442695, %v335_v52  ;;  %v328_v62 = vpop.xlane.xlu1 %327  ;;  %v491_v45 = vmul.u32 56, %v461_v34  ;;  %v521_v48 = vshrl.u32 %v505_v39, 16  ;;  %v484_v49 = vadd.s32 64, %v462_v36 }
 0x1c4   :  { %v1504_v0 = vpop.eup %1252  ;;  %v344_v59 = vsub.f32 %v1448_v57, %v328_v62  ;;  %411 = vadd.xlane.f32.xlu1 %v410_v63  ;;  %v304_v1 = vpop.xlane.xlu0 %303  ;;  %v383_v2 = vsel %vm280_vm0, %v1500_v60, 0.0  ;;  %v554_v44 = vmul.u32 2246822507, %v538_v37  ;;  %v546_v47 = vxor.u32 %v530_v38, %v514_v30 }
 0x1c5   :  { %1262 = vpow2.f32 %v357_v61  ;;  %v336_v58 = vsub.f32 %v1446_v56, %v304_v1  ;;  %384 = vadd.xlane.f32.xlu0 %v383_v2  ;;  %v407_v6 = vsel %vm280_vm0, %v1504_v0, 0.0  ;;  %v513_v51 = vadd.s32 %v497_v40, %v1547_v23 }
 0x1c6   :  { %1264 = vpow2.f32 %v373_v55  ;;  %v375_v3 = vmul.f32 1.442695, %v344_v59  ;;  %v508_v53 = vadd.s32 %v492_v42, %v1547_v23  ;;  %v499_v54 = vmul.u32 56, %v483_v43 }
 0x1c7   :  { %v1510_v4 = vpop.eup %1254  ;;  %v359_v5 = vmul.f32 1.442695, %v336_v58  ;;  %v570_v52 = vshrl.u32 %v554_v44, 13  ;;  %v507_v55 = vadd.s32 %v491_v45, %v1547_v23  ;;  %v562_v61 = vmul.u32 2246822507, %v546_v47 }
 0x1c8   :  { %v1514_v7 = vpop.eup %1256  ;;  %408 = vadd.xlane.f32.xlu1 %v407_v6  ;;  %v392_v57 = vsel %vm280_vm0, %v1510_v4, 0.0  ;;  %v537_v62 = vxor.u32 %v521_v48, %v505_v39  ;;  %v500_v63 = vmul.u32 56, %v484_v49  ;;  %v529_v59 = vshrl.u32 %v513_v51, 16 }
 0x1c9   :  { %1266 = vpow2.f32 %v359_v5  ;;  %393 = vadd.xlane.f32.xlu0 %v392_v57  ;;  %v416_v56 = vsel %vm280_vm0, %v1514_v7, 0.0  ;;  %v524_v1 = vshrl.u32 %v508_v53, 16  ;;  %v515_v2 = vadd.s32 %v499_v54, %v1547_v23 }
 0x1ca   :  { %1268 = vpow2.f32 %v375_v3  ;;  %v586_v58 = vxor.u32 %v570_v52, %v554_v44  ;;  %v523_v3 = vshrl.u32 %v507_v55, 16  ;;  %v463_v5 = vadd.s32 32, %v1544_v21 }
 0x1cb   :  { %v1518_v8 = vpop.eup %1258  ;;  %v578_v6 = vshrl.u32 %v562_v61, 13  ;;  %v553_v57 = vmul.u32 2246822507, %v537_v62  ;;  %v465_v30 = vadd.s32 48, %v1544_v21 }
 0x1cc   :  { %v1522_v9 = vpop.eup %1260  ;;  %417 = vadd.xlane.f32.xlu1 %v416_v56  ;;  %v389_v10 = vsel %vm280_vm0, %v1518_v8, 0.0  ;;  %v516_v56 = vadd.s32 %v500_v63, %v1547_v23  ;;  %v485_v20 = vadd.s32 64, %v463_v5  ;;  %v493_v27 = vmul.u32 56, %v463_v5 }
 0x1cd   :  { %390 = vadd.xlane.f32.xlu0 %v389_v10  ;;  %v413_v12 = vsel %vm280_vm0, %v1522_v9, 0.0  ;;  %v545_v10 = vxor.u32 %v529_v59, %v513_v51  ;;  %v594_v22 = vxor.u32 %v578_v6, %v562_v61  ;;  %v569_v24 = vshrl.u32 %v553_v57, 13 }
 0x1ce   :  { %v532_v25 = vshrl.u32 %v516_v56, 16  ;;  %v501_v38 = vmul.u32 56, %v485_v20  ;;  %v509_v43 = vadd.s32 %v493_v27, %v1547_v23  ;;  %v495_v47 = vmul.u32 56, %v465_v30 }
 0x1cf   :  { %v1526_v11 = vpop.eup %1262  ;;  %v561_v28 = vmul.u32 2246822507, %v545_v10  ;;  %v610_v39 = vmul.u32 3266489909, %v594_v22  ;;  %v585_v40 = vxor.u32 %v569_v24, %v553_v57  ;;  %v487_v51 = vadd.s32 64, %v465_v30 }
 0x1d0   :  { %v1530_v13 = vpop.eup %1264  ;;  %414 = vadd.xlane.f32.xlu1 %v413_v12  ;;  %v395_v14 = vsel %vm280_vm0, %v1526_v11, 0.0  ;;  %v464_v12 = vadd.s32 40, %v1544_v21  ;;  %v548_v42 = vxor.u32 %v532_v25, %v516_v56  ;;  %v517_v61 = vadd.s32 %v501_v38, %v1547_v23 }
 0x1d1   :  { %396 = vadd.xlane.f32.xlu0 %v395_v14  ;;  %v419_v16 = vsel %vm280_vm0, %v1530_v13, 0.0  ;;  %v540_v14 = vxor.u32 %v524_v1, %v508_v53  ;;  %v577_v44 = vshrl.u32 %v561_v28, 13  ;;  %v466_v53 = vadd.s32 56, %v1544_v21 }
 0x1d2   :  { %v494_v29 = vmul.u32 56, %v464_v12  ;;  %v486_v32 = vadd.s32 64, %v464_v12  ;;  %v626_v62 = vshrl.u32 %v610_v39, 16  ;;  %v601_v63 = vmul.u32 3266489909, %v585_v40 }
 0x1d3   :  { %v1534_v15 = vpop.eup %1266  ;;  %v556_v33 = vmul.u32 2246822507, %v540_v14  ;;  %v564_v59 = vmul.u32 2246822507, %v548_v42  ;;  %v525_v1 = vshrl.u32 %v509_v43, 16  ;;  %v488_v10 = vadd.s32 64, %v466_v53 }
 0x1d4   :  { %v1538_v17 = vpop.eup %1268  ;;  %420 = vadd.xlane.f32.xlu1 %v419_v16  ;;  %v398_v18 = vsel %vm280_vm0, %v1534_v15, 0.0  ;;  %v531_v16 = vshrl.u32 %v515_v2, 16  ;;  %v510_v45 = vadd.s32 %v494_v29, %v1547_v23  ;;  %v502_v48 = vmul.u32 56, %v486_v32 }
 0x1d5   :  { %399 = vadd.xlane.f32.xlu0 %v398_v18  ;;  %v422_v19 = vsel %vm280_vm0, %v1538_v17, 0.0  ;;  %v602_v18 = vmul.u32 3266489909, %v586_v58  ;;  %v503_v56 = vmul.u32 56, %v487_v51  ;;  %v580_v20 = vshrl.u32 %v564_v59, 13 }
 0x1d6   :  { %v547_v34 = vxor.u32 %v531_v16, %v515_v2  ;;  %v593_v2 = vxor.u32 %v577_v44, %v561_v28  ;;  %v526_v58 = vshrl.u32 %v510_v45, 16  ;;  %v518_v5 = vadd.s32 %v502_v48, %v1547_v23 }
 0x1d7   :  { %v618_v36 = vshrl.u32 %v602_v18, 16  ;;  %v496_v21 = vmul.u32 56, %v466_v53  ;;  %v533_v16 = vshrl.u32 %v517_v61, 16  ;;  %v541_v22 = vxor.u32 %v525_v1, %v509_v43 }
 0x1d8   :  { %423 = vadd.xlane.f32.xlu1 %v422_v19  ;;  %v539_v19 = vxor.u32 %v523_v3, %v507_v55  ;;  %v563_v49 = vmul.u32 2246822507, %v547_v34  ;;  %v572_v55 = vshrl.u32 %v556_v33, 13  ;;  %v511_v3 = vadd.s32 %v495_v47, %v1547_v23 }
 0x1d9   :  { %v1567_v54 = vxor.u32 %v618_v36, %v602_v18  ;;  %v1572_v18 = vxor.u32 %v626_v62, %v610_v39  ;;  %v609_v24 = vmul.u32 3266489909, %v593_v2  ;;  %v542_v25 = vxor.u32 %v526_v58, %v510_v45 }
 0x1da   :  { %v555_v37 = vmul.u32 2246822507, %v539_v19  ;;  %v579_v57 = vshrl.u32 %v563_v49, 13  ;;  %v588_v14 = vxor.u32 %v572_v55, %v556_v33  ;;  %v617_v19 = vshrl.u32 %v601_v63, 16 }
 0x1db   :  { %v527_v27 = vshrl.u32 %v511_v3, 16  ;;  %v534_v28 = vshrl.u32 %v518_v5, 16  ;;  %v519_v34 = vadd.s32 %v503_v56, %v1547_v23  ;;  %v512_v36 = vadd.s32 %v496_v21, %v1547_v23 }
 0x1dc   :  { %v571_v52 = vshrl.u32 %v555_v37, 13  ;;  %v595_v32 = vxor.u32 %v579_v57, %v563_v49  ;;  %v504_v38 = vmul.u32 56, %v488_v10  ;;  %v549_v39 = vxor.u32 %v533_v16, %v517_v61 }
 0x1dd   :  { %v1576_v40 = vxor.u32 %v617_v19, %v601_v63  ;;  %v596_v42 = vxor.u32 %v580_v20, %v564_v59  ;;  %v557_v43 = vmul.u32 2246822507, %v541_v22  ;;  %v625_v44 = vshrl.u32 %v609_v24, 16 }
 0x1de   :  { %v587_v12 = vxor.u32 %v571_v52, %v555_v37  ;;  %v604_v37 = vmul.u32 3266489909, %v588_v14  ;;  %v558_v45 = vmul.u32 2246822507, %v542_v25  ;;  %v1578_v47 = vxor.u32 %v527_v27, %v511_v3 }
 0x1df   :  { %v1580_v48 = vxor.u32 %v534_v28, %v518_v5  ;;  %v611_v51 = vmul.u32 3266489909, %v595_v32  ;;  %v535_v53 = vshrl.u32 %v519_v34, 16  ;;  %v528_v52 = vshrl.u32 %v512_v36, 16 }
 0x1e0   :  { %v603_v33 = vmul.u32 3266489909, %v587_v12  ;;  %v520_v55 = vadd.s32 %v504_v38, %v1547_v23  ;;  %v620_v1 = vshrl.u32 %v604_v37, 16  ;;  %v565_v63 = vmul.u32 2246822507, %v549_v39 }
 0x1e1   :  { %vm649_vm1 = vcmp.ge.u32.totalorder %v1576_v40, 429496729  ;;  %v612_v59 = vmul.u32 3266489909, %v596_v42  ;;  %v573_v2 = vshrl.u32 %v557_v43, 13  ;;  %v1585_v3 = vxor.u32 %v625_v44, %v609_v24 }
 0x1e2   :  { %v619_v61 = vshrl.u32 %v603_v33, 16  ;;  %vm650_vm2 = vcmp.ge.u32.totalorder %v1567_v54, 429496729  ;;  %v574_v5 = vshrl.u32 %v558_v45, 13  ;;  %v566_v23 = vmul.u32 2246822507, %v1580_v48 }
 0x1e3   :  { %v627_v56 = vshrl.u32 %v611_v51, 16  ;;  %v1589_v21 = vxor.u32 %v535_v53, %v519_v34  ;;  %v1591_v10 = vxor.u32 %v528_v52, %v512_v36  ;;  %v536_v12 = vshrl.u32 %v520_v55, 16 }
 0x1e4   :  { %v1593_v16 = vxor.u32 %v619_v61, %v603_v33  ;;  %v1595_v19 = vxor.u32 %v620_v1, %v604_v37  ;;  %v581_v20 = vshrl.u32 %v565_v63, 13  ;;  %vm658_vm3 = vcmp.ge.u32.totalorder %v1572_v18, 429496729 }
 0x1e5   :  { %v628_v24 = vshrl.u32 %v612_v59, 16  ;;  %v1598_v25 = vxor.u32 %v573_v2, %v557_v43  ;;  %vm657_vm4 = vcmp.ge.u32.totalorder %v1585_v3, 429496729  ;;  %v1601_v28 = vxor.u32 %v574_v5, %v558_v45 }
 0x1e6   :  { %v1603_v36 = vxor.u32 %v627_v56, %v611_v51  ;;  %v567_v38 = vmul.u32 2246822507, %v1589_v21  ;;  %v560_v33 = vmul.u32 2246822507, %v1591_v10  ;;  %v1607_v37 = vxor.u32 %v536_v12, %v520_v55 }
 0x1e7   :  { %v1609_v44 = vxor.u32 %v581_v20, %v565_v63  ;;  %vm651_vm5 = vcmp.ge.u32.totalorder %v1593_v16, 429496729  ;;  %v605_v48 = vmul.u32 3266489909, %v1598_v25  ;;  %vm652_vm6 = vcmp.ge.u32.totalorder %v1595_v19, 429496729 }
 0x1e8   :  { %v606_v53 = vmul.u32 3266489909, %v1601_v28  ;;  %v583_v1 = vshrl.u32 %v567_v38, 13  ;;  %v576_v63 = vshrl.u32 %v560_v33, 13  ;;  %vm659_vm7 = vcmp.ge.u32.totalorder %v1603_v36, 429496729 }
 0x1e9   :  { %v613_v5 = vmul.u32 3266489909, %v1609_v44 }
 0x1ea   :  { %v622_v3 = vshrl.u32 %v606_v53, 16 }
 0x245   :  { %v382_v6 = vpop.xlane.xlu0 %381 }
 0x246   :  { %1270 = vrcp.f32 %v382_v6  ;;  %v559_v6 = vmul.u32 2246822507, %v1578_v47  ;;  %v1613_v47 = vxor.u32 %v628_v24, %v612_v59  ;;  %v568_v59 = vmul.u32 2246822507, %v1607_v37 }
 0x248   :  { %v584_v20 = vshrl.u32 %v568_v59, 13  ;;  %vm660_vm8 = vcmp.ge.u32.totalorder %v1613_v47, 429496729 }
 0x249   :  { %v406_v29 = vpop.xlane.xlu1 %405  ;;  %v379_v30 = vpop.xlane.xlu0 %378 }
 0x24a   :  { %1272 = vrcp.f32 %v406_v29  ;;  %v575_v29 = vshrl.u32 %v559_v6, 13 }
 0x24b   :  { %1274 = vrcp.f32 %v379_v30  ;;  %v582_v30 = vshrl.u32 %v566_v23, 13 }
 0x24c   :  { %v1619_v52 = vxor.u32 %v575_v29, %v559_v6 }
 0x24d   :  { %v403_v49 = vpop.xlane.xlu1 %402  ;;  %v1621_v55 = vxor.u32 %v582_v30, %v566_v23 }
 0x24e   :  { %1276 = vrcp.f32 %v403_v49  ;;  %v388_v62 = vpop.xlane.xlu0 %387  ;;  %v607_v40 = vmul.u32 3266489909, %v1619_v52 }
 0x24f   :  { %1278 = vrcp.f32 %v388_v62  ;;  %v614_v21 = vmul.u32 3266489909, %v1621_v55 }
 0x250   :  { %v1271_v58 = vpop.eup %1270 }
 0x251   :  { %v412_v57 = vpop.xlane.xlu1 %411  ;;  %v666_v22 = vmul.f32 1.1111112, %v1271_v58 }
 0x252   :  { %1280 = vrcp.f32 %v412_v57  ;;  %v385_v14 = vpop.xlane.xlu0 %384 }
 0x253   :  { %1282 = vrcp.f32 %v385_v14  ;;  %v682_v45 = vmul.f32 %v1472_v26, %v666_v22  ;;  %v1638_v14 = vxor.u32 %v583_v1, %v567_v38  ;;  %v623_v38 = vshrl.u32 %v607_v40, 16 }
 0x254   :  { %v1273_v27 = vpop.eup %1272 }
 0x255   :  { %v1275_v32 = vpop.eup %1274  ;;  %v409_v34 = vpop.xlane.xlu1 %408  ;;  %v674_v39 = vmul.f32 1.1111112, %v1273_v27  ;;  %v698_v6 = vsel %vm650_vm2, %v682_v45, 0.0 }
 0x256   :  { %v665_v42 = vmul.f32 1.1111112, %v1275_v32  ;;  %1284 = vrcp.f32 %v409_v34  ;;  %v394_v43 = vpop.xlane.xlu0 %393  ;;  %v629_v34 = vshrl.u32 %v613_v5, 16 }
 0x257   :  { %1286 = vrcp.f32 %v394_v43  ;;  %v690_v2 = vmul.f32 %v1480_v35, %v674_v39  ;;  %v621_v35 = vshrl.u32 %v605_v48, 16  ;;  %v600_v43 = vxor.u32 %v584_v20, %v568_v59 }
 0x258   :  { %v1277_v49 = vpop.eup %1276  ;;  %v681_v51 = vmul.f32 %v1476_v31, %v665_v42  ;;  %v630_v42 = vshrl.u32 %v614_v21, 16 }
 0x259   :  { %v1279_v62 = vpop.eup %1278  ;;  %v673_v26 = vmul.f32 1.1111112, %v1277_v49  ;;  %v418_v61 = vpop.xlane.xlu1 %417  ;;  %v706_v22 = vsel %vm658_vm3, %v690_v2, 0.0  ;;  %v637_v32 = vxor.u32 %v621_v35, %v605_v48 }
 0x25a   :  { %1288 = vrcp.f32 %v418_v61  ;;  %v697_v31 = vsel %vm649_vm1, %v681_v51, 0.0  ;;  %v391_v58 = vpop.xlane.xlu0 %390  ;;  %v668_v57 = vmul.f32 1.1111112, %v1279_v62  ;;  %v645_v62 = vxor.u32 %v629_v34, %v613_v5 }
 0x25b   :  { %v689_v23 = vmul.f32 %v1486_v41, %v673_v26  ;;  %1147 = vmatprep.mubr.msk.f32.mxu0 %vm280_vm0, %v697_v31  ;;  %1290 = vrcp.f32 %v391_v58  ;;  %v1640_v41 = vxor.u32 %v576_v63, %v560_v33  ;;  %v616_v63 = vmul.u32 3266489909, %v600_v43 }
 0x25c   :  { %v1281_v56 = vpop.eup %1280  ;;  %1148 = vmatmul.mubr.msk.f32.vlgmr.msra.gmra.mrb[8].mxu0 %vm280_vm0, %v698_v6  ;;  %v684_v29 = vmul.f32 %v1490_v46, %v668_v57  ;;  %v615_v46 = vmul.u32 3266489909, %v1638_v14  ;;  %vm653_vm9 = vcmp.ge.u32.totalorder %v637_v32, 429496729  ;;  %vm661_vm11 = vcmp.ge.u32.totalorder %v645_v62, 429496729 }
 0x25d   :  { %v1283_v10 = vpop.eup %1282  ;;  %v415_v12 = vpop.xlane.xlu1 %414  ;;  %v705_v54 = vsel %vm657_vm4, %v689_v23, 0.0  ;;  %v676_v24 = vmul.f32 1.1111112, %v1281_v56  ;;  %v608_v51 = vmul.u32 3266489909, %v1640_v41  ;;  %v632_v35 = vshrl.u32 %v616_v63, 16 }
 0x25e   :  { %v667_v25 = vmul.f32 1.1111112, %v1283_v10  ;;  %1292 = vrcp.f32 %v415_v12  ;;  %1173 = vmatprep.mubr.msk.f32.mxu1 %vm280_vm0, %v705_v54  ;;  %v397_v27 = vpop.xlane.xlu0 %396  ;;  %v700_v52 = vsel %vm652_vm6, %v684_v29, 0.0  ;;  %v631_v1 = vshrl.u32 %v615_v46, 16 }
 0x25f   :  { %1294 = vrcp.f32 %v397_v27  ;;  %1174 = vmatmul.mubr.msk.f32.vlgmr.msra.gmra.mrb[8].mxu1 %vm280_vm0, %v706_v22  ;;  %v692_v44 = vmul.f32 %v1494_v50, %v676_v24  ;;  %v638_v50 = vxor.u32 %v622_v3, %v606_v53  ;;  %v646_v53 = vxor.u32 %v630_v42, %v614_v21 }
 0x260   :  { %v1285_v30 = vpop.eup %1284  ;;  %v683_v18 = vmul.f32 %v1500_v60, %v667_v25  ;;  %v624_v31 = vshrl.u32 %v608_v51, 16  ;;  %v647_v23 = vxor.u32 %v631_v1, %v615_v46  ;;  %v648_v20 = vxor.u32 %v632_v35, %v616_v63 }
 0x261   :  { %v1287_v33 = vpop.eup %1286  ;;  %v675_v37 = vmul.f32 1.1111112, %v1285_v30  ;;  %v421_v39 = vpop.xlane.xlu1 %420  ;;  %v708_v19 = vsel %vm660_vm8, %v692_v44, 0.0  ;;  %vm654_vm10 = vcmp.ge.u32.totalorder %v638_v50, 429496729 }
 0x262   :  { %1296 = vrcp.f32 %v421_v39  ;;  %v400_v45 = vpop.xlane.xlu0 %399  ;;  %v699_v49 = vsel %vm651_vm5, %v683_v18, 0.0  ;;  %v670_v48 = vmul.f32 1.1111112, %v1287_v33  ;;  %vm662_vm13 = vcmp.ge.u32.totalorder %v646_v53, 429496729 }
 0x263   :  { %v691_v60 = vmul.f32 %v1504_v0, %v675_v37  ;;  %1298 = vrcp.f32 %v400_v45  ;;  %1150 = vmatprep.mubr.msk.f32.mxu0 %vm280_vm0, %v699_v49  ;;  %v639_v0 = vxor.u32 %v623_v38, %v607_v40  ;;  %v640_v21 = vxor.u32 %v624_v31, %v608_v51 }
 0x264   :  { %v1289_v55 = vpop.eup %1288  ;;  %1151 = vmatmul.mubr.msk.f32.gmra.mrb[10].mxu0 %vm280_vm0, %v700_v52  ;;  %v686_v28 = vmul.f32 %v1510_v4, %v670_v48  ;;  %vm663_vm14 = vcmp.ge.u32.totalorder %v647_v23, 429496729  ;;  %vm664_vm1 = vcmp.ge.u32.totalorder %v648_v20, 429496729 }
 0x265   :  { %v1291_v16 = vpop.eup %1290  ;;  %v424_v26 = vpop.xlane.xlu1 %423  ;;  %v707_v61 = vsel %vm659_vm7, %v691_v60, 0.0  ;;  %v678_v59 = vmul.f32 1.1111112, %v1289_v55  ;;  %vm655_vm12 = vcmp.ge.u32.totalorder %v639_v0, 429496729 }
 0x266   :  { %v669_v2 = vmul.f32 1.1111112, %v1291_v16  ;;  %1300 = vrcp.f32 %v424_v26  ;;  %1176 = vmatprep.mubr.msk.f32.mxu1 %vm280_vm0, %v707_v61  ;;  %v702_v40 = vsel %vm654_vm10, %v686_v28, 0.0  ;;  %vm656_vm15 = vcmp.ge.u32.totalorder %v640_v21, 429496729 }
 0x267   :  { %1177 = vmatmul.mubr.msk.f32.gmra.mrb[10].mxu1 %vm280_vm0, %v708_v19  ;;  %v694_v57 = vmul.f32 %v1514_v7, %v678_v59 }
 0x268   :  { %v1293_v36 = vpop.eup %1292  ;;  %v685_v58 = vmul.f32 %v1518_v8, %v669_v2 }
 0x269   :  { %v1295_v5 = vpop.eup %1294  ;;  %v677_v6 = vmul.f32 1.1111112, %v1293_v36  ;;  %v710_v41 = vsel %vm662_vm13, %v694_v57, 0.0 }
 0x26a   :  { %v671_v47 = vmul.f32 1.1111112, %v1295_v5  ;;  %v701_v56 = vsel %vm653_vm9, %v685_v58, 0.0 }
 0x26b   :  { %v693_v4 = vmul.f32 %v1522_v9, %v677_v6  ;;  %1153 = vmatprep.mubr.msk.f32.mxu0 %vm280_vm0, %v701_v56 }
 0x26c   :  { %v1297_v10 = vpop.eup %1296  ;;  %v687_v8 = vmul.f32 %v1526_v11, %v671_v47  ;;  %1154 = vmatmul.mubr.msk.f32.gmra.mrb[12].mxu0 %vm280_vm0, %v702_v40 }
 0x26d   :  { %v1299_v12 = vpop.eup %1298  ;;  %v679_v54 = vmul.f32 1.1111112, %v1297_v10  ;;  %v709_v14 = vsel %vm661_vm11, %v693_v4, 0.0 }
 0x26e   :  { %v672_v7 = vmul.f32 1.1111112, %v1299_v12  ;;  %1179 = vmatprep.mubr.msk.f32.mxu1 %vm280_vm0, %v709_v14  ;;  %v703_v9 = vsel %vm655_vm12, %v687_v8, 0.0 }
 0x26f   :  { %v695_v22 = vmul.f32 %v1530_v13, %v679_v54  ;;  %1156 = vmatprep.mubr.msk.f32.mxu0 %vm280_vm0, %v703_v9  ;;  %1180 = vmatmul.mubr.msk.f32.gmra.mrb[12].mxu1 %vm280_vm0, %v710_v41 }
 0x270   :  { %v1301_v11 = vpop.eup %1300  ;;  %v688_v24 = vmul.f32 %v1534_v15, %v672_v7 }
 0x271   :  { %v680_v25 = vmul.f32 1.1111112, %v1301_v11  ;;  %v711_v27 = vsel %vm663_vm14, %v695_v22, 0.0 }
 0x272   :  { %1182 = vmatprep.mubr.msk.f32.mxu1 %vm280_vm0, %v711_v27  ;;  %v704_v29 = vsel %vm656_vm15, %v688_v24, 0.0 }
 0x273   :  { %v696_v3 = vmul.f32 %v1538_v17, %v680_v25  ;;  %1157 = vmatmul.mubr.msk.f32.gmra.mrb[14].mxu0 %vm280_vm0, %v704_v29 }
 0x275   :  { %v712_v30 = vsel %vm664_vm1, %v696_v3, 0.0 }
 0x276   :  { %1183 = vmatmul.mubr.msk.f32.gmra.mrb[14].mxu1 %vm280_vm0, %v712_v30 }
 0x32f   :  { %v1149_v13 = vpop.f32.mrb[8].mxu0 }
 0x330   :  { %972 = vst [vmem:[#allocation7 + $0x8] sm:$0xff] %v1149_v13  ;;  %v803_v18 = vpop.f32.mrb[9].mxu0 }
 0x331   :  { %971 = vst [vmem:[#allocation7] sm:$0xff] %v803_v18 }
 0x332   :  { %v1175_v32 = vpop.f32.mrb[8].mxu1 }
 0x333   :  { %980 = vst [vmem:[#allocation7 + $0x48] sm:$0xff] %v1175_v32  ;;  %v932_v15 = vpop.f32.mrb[9].mxu1 }
 0x334   :  { %979 = vst [vmem:[#allocation7 + $0x40] sm:$0xff] %v932_v15 }
 0x337   :  { %v1152_v34 = vpop.f32.mrb[10].mxu0 }
 0x338   :  { %974 = vst [vmem:[#allocation7 + $0x18] sm:$0xff] %v1152_v34  ;;  %v813_v38 = vpop.f32.mrb[11].mxu0 }
 0x339   :  { %973 = vst [vmem:[#allocation7 + $0x10] sm:$0xff] %v813_v38 }
 0x33a   :  { %v1178_v33 = vpop.f32.mrb[10].mxu1 }
 0x33b   :  { %982 = vst [vmem:[#allocation7 + $0x58] sm:$0xff] %v1178_v33  ;;  %v942_v17 = vpop.f32.mrb[11].mxu1 }
 0x33c   :  { %981 = vst [vmem:[#allocation7 + $0x50] sm:$0xff] %v942_v17 }
 0x33f   :  { %v1155_v37 = vpop.f32.mrb[12].mxu0 }
 0x340   :  { %976 = vst [vmem:[#allocation7 + $0x28] sm:$0xff] %v1155_v37  ;;  %v823_v39 = vpop.f32.mrb[13].mxu0 }
 0x341   :  { %975 = vst [vmem:[#allocation7 + $0x20] sm:$0xff] %v823_v39 }
 0x342   :  { %v1181_v42 = vpop.f32.mrb[12].mxu1 }
 0x343   :  { %984 = vst [vmem:[#allocation7 + $0x68] sm:$0xff] %v1181_v42  ;;  %v952_v46 = vpop.f32.mrb[13].mxu1 }
 0x344   :  { %983 = vst [vmem:[#allocation7 + $0x60] sm:$0xff] %v952_v46 }
 0x346   :  { %v1158_v43 = vpop.f32.mrb[14].mxu0 }
 0x347   :  { %978 = vst [vmem:[#allocation7 + $0x38] sm:$0xff] %v1158_v43  ;;  %v833_v44 = vpop.f32.mrb[15].mxu0 }
 0x348   :  { %977 = vst [vmem:[#allocation7 + $0x30] sm:$0xff] %v833_v44 }
 0x349   :  { %v1184_v45 = vpop.f32.mrb[14].mxu1 }
 0x34a   :  { %986 = vst [vmem:[#allocation7 + $0x78] sm:$0xff] %v1184_v45  ;;  %v962_v49 = vpop.f32.mrb[15].mxu1 }
 0x34b   :  { %985 = vst [vmem:[#allocation7 + $0x70] sm:$0xff] %v962_v49 }
 0x34c   :  { %1357 = shalt.err (!%p1354_p6)
}
 0x34d   :  { %s1358_s10 = scalar_lea.hbm %s1704_s2, 2048 }
 0x34e   :  { %p1359_p7 = scmp.ne.s32.totalorder %s1704_s2, %s1358_s10  ;;  %p1362_p8 = scmp.lt.u32.totalorder %s1358_s10, %s1704_s2 }
 0x350   :  { %p1364_p9 = pnand %p1362_p8, %p1359_p7 }
 0x352   :  { %1367 = shalt.err (!%p1364_p9)
}
 0x353   :  { %998 = dma.vmem_to_hbm [thread:$0]  %s993_s6, 2048, %s1704_s2, [#allocation4], %s1375_s19, %s1375_s19, %s1376_s20  }
 0x354   :  { %1372 = dma.done.wait [#allocation4], 2048  }
 0x355   :  { %1373 = vsyncadd [#allocation4], 4294965248 }
 0x356   :  { %1002 = vsyncpa [#allocation3], 1 }
 0x357   :  { %1003 = vsyncpa [#allocation6], 1 }
 0x358   :  { %1004 = vsyncpa [#allocation4], 1 }

</bundles_post_ra>
